<compile_context>
chip_gen: v5e
topology: v5e:2x2
jax: 0.10.0
libtpu: 0.0.40
codegen_flags: <defaults>
</compile_context>

<pallas_src>
import functools

import jax
import jax.numpy as jnp
from jax.experimental import pallas as pl
from jax.experimental.pallas import tpu as pltpu

_LANE = 128     # vreg lane width   -> last-dim padding multiple (lane-dense stores)
_SUBLANE = 8    # vreg sublanes     -> second-to-last-dim padding multiple
_DEFAULT_TM = 256   # batch tile (rows per grid step); multiple of 8


def _round_up(n, m):
    return ((n + m - 1) // m) * m


def _mlp_kernel(*refs, num_layers):
    """Fused MLP over one batch tile.

    refs = (x, w0, b0, w1, b1, ..., w_{L-1}, b_{L-1}, out).
    Weights/biases have constant index_maps (VMEM-resident across batch tiles).
    Each matmul accumulates in f32 on the MXU; bias-add / ReLU run in f32 on
    the VPU; the activation is cast back to the compute dtype only to feed the
    next MXU pass (no-op for the f32 path).
    """
    x_ref = refs[0]
    o_ref = refs[-1]
    h = x_ref[...]                                   # (tm, D0_pad), compute dtype
    for i in range(num_layers):                      # static (trace-time) unroll
        w = refs[1 + 2 * i][...]                     # (Din_pad, Dout_pad), compute dtype
        b = refs[2 + 2 * i][...]                     # (1, Dout_pad), f32
        acc = jnp.dot(h, w, preferred_element_type=jnp.float32)
        acc = acc + b                                # broadcasts over batch, f32
        if i < num_layers - 1:
            acc = jnp.maximum(acc, 0.0)              # ReLU on hidden layers only
            h = acc.astype(x_ref.dtype)
        else:
            o_ref[...] = acc.astype(o_ref.dtype)


def prepare_params(params, compute_dtype=jnp.bfloat16):
    """Pad / cast weights ONCE (hoisted out of the forward path).

    params: [(W (in,out), b (1,out)), ...] ->
      (flat padded tuple (w0,b0,w1,b1,...), dims, dims_pad)
    Zero padding is inert: padded x cols hit zero W rows (contribute 0), zero
    W cols + zero bias give relu(0)=0 activations, which feed zero W rows in
    the next layer.
    """
    dims = tuple([params[0][0].shape[0]] + [w.shape[1] for (w, _) in params])
    dims_pad = tuple(_round_up(max(d, _LANE), _LANE) for d in dims)
    flat = []
    for i, (w, b) in enumerate(params):
        di, do = dims_pad[i], dims_pad[i + 1]
        w_p = (jnp.zeros((di, do), compute_dtype)
               .at[:w.shape[0], :w.shape[1]].set(w.astype(compute_dtype)))
        b_p = (jnp.zeros((1, do), jnp.float32)
               .at[:, :b.shape[1]].set(b.astype(jnp.float32)))
        flat += [w_p, b_p]
    return tuple(flat), dims, dims_pad


@functools.partial(jax.jit, static_argnames=("dims", "dims_pad", "tm"))
def fully_connected_nn(x, flat_params, dims, dims_pad, tm=_DEFAULT_TM):
    """Forward pass matching the PyTorch module: hidden Linear+ReLU, final Linear.

    x: (B, dims[0]) f32.  flat_params: output of prepare_params (already padded
    and cast to the compute dtype).  Returns (B, dims[-1]) f32.
    One fused Pallas call with a batch-tiled grid and resident weights.
    """
    B, Din = x.shape
    num_layers = len(flat_params) // 2
    Dout = dims[-1]
    compute_dtype = flat_params[0].dtype

    # Batch tile: multiple of 8 sublanes, no larger than the (padded) batch.
    tm = min(tm, _round_up(max(B, _SUBLANE), _SUBLANE))
    B_pad = _round_up(max(B, _SUBLANE), tm)

    # Pad x to (B_pad, D0_pad) in the compute dtype (zero rows/cols are inert).
    x_c = x.astype(compute_dtype)
    if (B_pad, dims_pad[0]) != (B, Din):
        x_p = (jnp.zeros((B_pad, dims_pad[0]), compute_dtype)
               .at[:B, :Din].set(x_c))
    else:
        x_p = x_c

    # BlockSpecs: activations stream per batch tile; weights/biases resident.
    in_specs = [pl.BlockSpec((tm, dims_pad[0]), lambda i: (i, 0))]
    for li in range(num_layers):
        in_specs.append(
            pl.BlockSpec((dims_pad[li], dims_pad[li + 1]), lambda i: (0, 0)))
        in_specs.append(
            pl.BlockSpec((1, dims_pad[li + 1]), lambda i: (0, 0)))
    out_spec = pl.BlockSpec((tm, dims_pad[-1]), lambda i: (i, 0))

    # VMEM budget: resident weights + biases (x2 buffers by default) plus the
    # double-buffered activation/output tiles; clamp to 64 MiB (<= physical on
    # every generation, incl. v7x).
    csize = jnp.dtype(compute_dtype).itemsize
    w_bytes = sum(dims_pad[li] * dims_pad[li + 1] * csize + dims_pad[li + 1] * 4
                  for li in range(num_layers))
    act_bytes = tm * dims_pad[0] * csize + tm * dims_pad[-1] * 4
    needed = 2 * (w_bytes + act_bytes)
    vmem_limit = int(min(64 * 2 ** 20, max(2 * needed, 16 * 2 ** 20)))

    out_p = pl.pallas_call(
        functools.partial(_mlp_kernel, num_layers=num_layers),
        out_shape=jax.ShapeDtypeStruct((B_pad, dims_pad[-1]), jnp.float32),
        grid=(B_pad // tm,),
        in_specs=in_specs,
        out_specs=out_spec,
        compiler_params=pltpu.CompilerParams(
            dimension_semantics=("parallel",),      # megacore-shard batch (v7x)
            vmem_limit_bytes=vmem_limit),
    )(x_p, *flat_params)

    return out_p[:B, :Dout]


def init_params(key, input_dim, hidden_dims, output_dim, dtype=jnp.float32):
    """Deterministic PyTorch-style (uniform +/- 1/sqrt(fan_in)) init.
    Weights are stored already transposed to (in, out) for the kernel."""
    dims = [input_dim] + list(hidden_dims) + [output_dim]
    params = []
    for i in range(len(dims) - 1):
        fan_in, fan_out = dims[i], dims[i + 1]
        key, kw, kb = jax.random.split(key, 3)
        bound = 1.0 / (fan_in ** 0.5)
        w = jax.random.uniform(kw, (fan_in, fan_out), dtype, -bound, bound)
        b = jax.random.uniform(kb, (1, fan_out), dtype, -bound, bound)
        params.append((w, b))
    return params


def _reference(x, params):
    ref = x
    for i, (w, b) in enumerate(params):
        ref = ref @ w + b
        if i < len(params) - 1:
            ref = jnp.maximum(ref, 0.0)
    return ref


if __name__ == "__main__":
    # Small shapes consistent with the module's forward: x is (batch, input_dim).
    input_dim = 16
    hidden_dims = [32, 32]
    output_dim = 4

    key = jax.random.PRNGKey(0)
    kx, kp, kx2 = jax.random.split(key, 3)
    params = init_params(kp, input_dim, hidden_dims, output_dim)

    # --- check 1: default bf16-compute / f32-accumulate path (MXU fast path) ---
    batch = 8
    x = jax.random.normal(kx, (batch, input_dim), dtype=jnp.float32)
    ref = _reference(x, params)

    flat_bf16, dims, dims_pad = prepare_params(params, compute_dtype=jnp.bfloat16)
    out_bf16 = fully_connected_nn(x, flat_bf16, dims, dims_pad)
    jax.block_until_ready(out_bf16)
    assert out_bf16.shape == (batch, output_dim)
    assert jnp.allclose(out_bf16, ref, atol=1e-1, rtol=1e-1)

    # --- check 2: f32 path, exact semantics ---
    flat_f32, dims, dims_pad = prepare_params(params, compute_dtype=jnp.float32)
    out_f32 = fully_connected_nn(x, flat_f32, dims, dims_pad)
    jax.block_until_ready(out_f32)
    assert out_f32.shape == (batch, output_dim)
    assert jnp.allclose(out_f32, ref, atol=1e-5, rtol=1e-5)

    # --- check 3: non-aligned batch with a multi-step grid (tm=16 -> grid=(3,)),
    #     exercising the batch-tiled pipeline + padding-row slicing ---
    batch2 = 40
    x2 = jax.random.normal(kx2, (batch2, input_dim), dtype=jnp.float32)
    ref2 = _reference(x2, params)
    out2 = fully_connected_nn(x2, flat_f32, dims, dims_pad, tm=16)
    jax.block_until_ready(out2)
    assert out2.shape == (batch2, output_dim)
    assert jnp.allclose(out2, ref2, atol=1e-5, rtol=1e-5)

    print("KERNEL_OK")
</pallas_src>

<mosaic_0001>
module attributes {stable_mosaic.version = 11 : i64} {
  func.func @_mlp_kernel(%arg0: i32, %arg1: memref<8x128xbf16, #tpu.memory_space<vmem>>, %arg2: memref<128x128xbf16, #tpu.memory_space<vmem>>, %arg3: memref<1x128xf32, #tpu.memory_space<vmem>>, %arg4: memref<128x128xbf16, #tpu.memory_space<vmem>>, %arg5: memref<1x128xf32, #tpu.memory_space<vmem>>, %arg6: memref<128x128xbf16, #tpu.memory_space<vmem>>, %arg7: memref<1x128xf32, #tpu.memory_space<vmem>>, %arg8: memref<8x128xf32, #tpu.memory_space<vmem>>) attributes {dimension_semantics = [#tpu.dimension_semantics<parallel>], iteration_bounds = array<i64: 1>, scalar_prefetch = 0 : i64, scratch_operands = 0 : i64, tpu.core_type = #tpu.core_type<tc>, window_params = [{transform_indices = @transform_0, window_bounds = array<i64: 8, 128>}, {pipeline_mode = #tpu.pipeline_mode<synchronous>, transform_indices = @transform_1, window_bounds = array<i64: 128, 128>}, {pipeline_mode = #tpu.pipeline_mode<synchronous>, transform_indices = @transform_2, window_bounds = array<i64: 1, 128>}, {pipeline_mode = #tpu.pipeline_mode<synchronous>, transform_indices = @transform_3, window_bounds = array<i64: 128, 128>}, {pipeline_mode = #tpu.pipeline_mode<synchronous>, transform_indices = @transform_4, window_bounds = array<i64: 1, 128>}, {pipeline_mode = #tpu.pipeline_mode<synchronous>, transform_indices = @transform_5, window_bounds = array<i64: 128, 128>}, {pipeline_mode = #tpu.pipeline_mode<synchronous>, transform_indices = @transform_6, window_bounds = array<i64: 1, 128>}, {transform_indices = @transform_7, window_bounds = array<i64: 8, 128>}]} {
    %c0 = arith.constant 0 : index
    %c0_0 = arith.constant 0 : index
    %0 = vector.load %arg1[%c0, %c0_0] : memref<8x128xbf16, #tpu.memory_space<vmem>>, vector<8x128xbf16>
    %c0_1 = arith.constant 0 : index
    %c0_2 = arith.constant 0 : index
    %1 = vector.load %arg2[%c0_1, %c0_2] : memref<128x128xbf16, #tpu.memory_space<vmem>>, vector<128x128xbf16>
    %c0_3 = arith.constant 0 : index
    %c0_4 = arith.constant 0 : index
    %2 = vector.load %arg3[%c0_3, %c0_4] : memref<1x128xf32, #tpu.memory_space<vmem>>, vector<1x128xf32>
    %cst = arith.constant dense<0.000000e+00> : vector<8x128xf32>
    %3 = tpu.matmul %0, %1, %cst {dimension_numbers = #tpu.dot_dimension_numbers<[1], [0], [0], [1], [0, 0, 1, 1], [], []>} : vector<8x128xbf16>, vector<128x128xbf16>, vector<8x128xf32> -> vector<8x128xf32>
    %4 = vector.broadcast %2 : vector<1x128xf32> to vector<8x128xf32>
    %5 = arith.addf %3, %4 : vector<8x128xf32>
    %cst_5 = arith.constant 0.000000e+00 : f32
    %6 = vector.broadcast %cst_5 : f32 to vector<8x128xf32>
    %7 = arith.maximumf %5, %6 : vector<8x128xf32>
    %8 = arith.truncf %7 : vector<8x128xf32> to vector<8x128xbf16>
    %c0_6 = arith.constant 0 : index
    %c0_7 = arith.constant 0 : index
    %9 = vector.load %arg4[%c0_6, %c0_7] : memref<128x128xbf16, #tpu.memory_space<vmem>>, vector<128x128xbf16>
    %c0_8 = arith.constant 0 : index
    %c0_9 = arith.constant 0 : index
    %10 = vector.load %arg5[%c0_8, %c0_9] : memref<1x128xf32, #tpu.memory_space<vmem>>, vector<1x128xf32>
    %cst_10 = arith.constant dense<0.000000e+00> : vector<8x128xf32>
    %11 = tpu.matmul %8, %9, %cst_10 {dimension_numbers = #tpu.dot_dimension_numbers<[1], [0], [0], [1], [0, 0, 1, 1], [], []>} : vector<8x128xbf16>, vector<128x128xbf16>, vector<8x128xf32> -> vector<8x128xf32>
    %12 = vector.broadcast %10 : vector<1x128xf32> to vector<8x128xf32>
    %13 = arith.addf %11, %12 : vector<8x128xf32>
    %cst_11 = arith.constant 0.000000e+00 : f32
    %14 = vector.broadcast %cst_11 : f32 to vector<8x128xf32>
    %15 = arith.maximumf %13, %14 : vector<8x128xf32>
    %16 = arith.truncf %15 : vector<8x128xf32> to vector<8x128xbf16>
    %c0_12 = arith.constant 0 : index
    %c0_13 = arith.constant 0 : index
    %17 = vector.load %arg6[%c0_12, %c0_13] : memref<128x128xbf16, #tpu.memory_space<vmem>>, vector<128x128xbf16>
    %c0_14 = arith.constant 0 : index
    %c0_15 = arith.constant 0 : index
    %18 = vector.load %arg7[%c0_14, %c0_15] : memref<1x128xf32, #tpu.memory_space<vmem>>, vector<1x128xf32>
    %cst_16 = arith.constant dense<0.000000e+00> : vector<8x128xf32>
    %19 = tpu.matmul %16, %17, %cst_16 {dimension_numbers = #tpu.dot_dimension_numbers<[1], [0], [0], [1], [0, 0, 1, 1], [], []>} : vector<8x128xbf16>, vector<128x128xbf16>, vector<8x128xf32> -> vector<8x128xf32>
    %20 = vector.broadcast %18 : vector<1x128xf32> to vector<8x128xf32>
    %21 = arith.addf %19, %20 : vector<8x128xf32>
    %c0_17 = arith.constant 0 : index
    %c0_18 = arith.constant 0 : index
    %22 = vector.load %arg8[%c0_17, %c0_18] : memref<8x128xf32, #tpu.memory_space<vmem>>, vector<8x128xf32>
    tpu.vector_store %arg8[%c0_17, %c0_18], %21 {strides = array<i32>} : memref<8x128xf32, #tpu.memory_space<vmem>>, vector<8x128xf32>,
    return
  }
  func.func @transform_0(%arg0: i32) -> (i32, i32) {
    %c0_i32 = arith.constant 0 : i32
    %c0_i32_0 = arith.constant 0 : i32
    return %arg0, %c0_i32 : i32, i32
  }
  func.func @transform_1(%arg0: i32) -> (i32, i32) {
    %c0_i32 = arith.constant 0 : i32
    %c0_i32_0 = arith.constant 0 : i32
    %c0_i32_1 = arith.constant 0 : i32
    return %c0_i32, %c0_i32_0 : i32, i32
  }
  func.func @transform_2(%arg0: i32) -> (i32, i32) {
    %c0_i32 = arith.constant 0 : i32
    %c0_i32_0 = arith.constant 0 : i32
    %c0_i32_1 = arith.constant 0 : i32
    return %c0_i32, %c0_i32_0 : i32, i32
  }
  func.func @transform_3(%arg0: i32) -> (i32, i32) {
    %c0_i32 = arith.constant 0 : i32
    %c0_i32_0 = arith.constant 0 : i32
    %c0_i32_1 = arith.constant 0 : i32
    return %c0_i32, %c0_i32_0 : i32, i32
  }
  func.func @transform_4(%arg0: i32) -> (i32, i32) {
    %c0_i32 = arith.constant 0 : i32
    %c0_i32_0 = arith.constant 0 : i32
    %c0_i32_1 = arith.constant 0 : i32
    return %c0_i32, %c0_i32_0 : i32, i32
  }
  func.func @transform_5(%arg0: i32) -> (i32, i32) {
    %c0_i32 = arith.constant 0 : i32
    %c0_i32_0 = arith.constant 0 : i32
    %c0_i32_1 = arith.constant 0 : i32
    return %c0_i32, %c0_i32_0 : i32, i32
  }
  func.func @transform_6(%arg0: i32) -> (i32, i32) {
    %c0_i32 = arith.constant 0 : i32
    %c0_i32_0 = arith.constant 0 : i32
    %c0_i32_1 = arith.constant 0 : i32
    return %c0_i32, %c0_i32_0 : i32, i32
  }
  func.func @transform_7(%arg0: i32) -> (i32, i32) {
    %c0_i32 = arith.constant 0 : i32
    %c0_i32_0 = arith.constant 0 : i32
    return %arg0, %c0_i32 : i32, i32
  }
}

</mosaic_0001>

<bundles_post_ra>
// kernel: fully_connected_nn.1
= control target key start
LH: loop header
LB: loop body
LE: loop exit
PB: predicated region body
PF: predicated region fallthrough
CT: control target
= control target key end

     0   :  { %12 = vsyncpa [#allocation3], 0  ;;  %s601_s0 = inlined_call_operand.vmem [shape: bf16[8,128], index: 0, kind: input, shape index: {}]   ;;  %s602_s1 = inlined_call_operand.hbm [shape: bf16[128,128], index: 1, kind: input, shape index: {}]   ;;  %s603_s2 = inlined_call_operand.vmem [shape: f32[1,128], index: 2, kind: input, shape index: {}]   ;;  %s604_s3 = inlined_call_operand.hbm [shape: bf16[128,128], index: 3, kind: input, shape index: {}]   ;;  %s605_s4 = inlined_call_operand.vmem [shape: f32[1,128], index: 4, kind: input, shape index: {}]   ;;  %s606_s5 = inlined_call_operand.hbm [shape: bf16[128,128], index: 5, kind: input, shape index: {}]   ;;  %s607_s6 = inlined_call_operand.vmem [shape: f32[1,128], index: 6, kind: input, shape index: {}]   ;;  %s608_s7 = inlined_call_operand.vmem [shape: f32[8,128], index: 7, kind: output, shape index: {}]  }
   0x1   :  { %13 = vsyncpa [#allocation5], 0  ;;  %s35_s26 = sshll.u32 %s604_s3, 4  ;;  %s532_s27 = smov [#allocation4]   ;;  %s36_s26 = int_to_ptr.hbm [resolvable:$true] %s35_s26 }
   0x2   :  { %s37_s28 = sshll.u32 %s532_s27, 4  ;;  %s20_s8 = sshll.u32 %s602_s1, 4  ;;  %s38_s28 = int_to_ptr.vmem [resolvable:$true] %s37_s28  ;;  %s21_s8 = int_to_ptr.hbm [resolvable:$true] %s20_s8 }
   0x3   :  { %s533_s9 = smov 64   ;;  %s534_s10 = smov 4  }
   0x4   :  { %43 = dma.hbm_to_vmem [thread:$0]  %s36_s26, 1024, %s38_s28, [#allocation5], %s533_s9, %s533_s9, %s534_s10  }
   0x5   :  { %s535_s11 = smov [#allocation2]   ;;  %s50_s15 = sshll.u32 %s606_s5, 4  ;;  %s51_s15 = int_to_ptr.hbm [resolvable:$true] %s50_s15 }
   0x6   :  { %s22_s12 = sshll.u32 %s535_s11, 4  ;;  %s536_s3 = smov [#allocation6]   ;;  %s23_s12 = int_to_ptr.vmem [resolvable:$true] %s22_s12 }
   0x7   :  { %28 = dma.hbm_to_vmem [thread:$0]  %s21_s8, 1024, %s23_s12, [#allocation3], %s533_s9, %s533_s9, %s534_s10  }
   0x8   :  { %s52_s16 = sshll.u32 %s536_s3, 4  ;;  %s53_s16 = int_to_ptr.vmem [resolvable:$true] %s52_s16 }
   0x9   :  { %58 = dma.hbm_to_vmem [thread:$0]  %s51_s15, 1024, %s53_s16, [#allocation5], %s533_s9, %s533_s9, %s534_s10  }
   0xa   :  { %528 = dma.done.wait [#allocation3], 1024  }
   0xb   :  { %529 = vsyncadd [#allocation3], 4294966272 }
   0xc   :  { %530 = dma.done.wait [#allocation5], 2048  }
   0xd   :  { %531 = vsyncadd [#allocation5], 4294965248  ;;  %v431_v0 = vld [vmem:[#allocation2 + $0x38] sm:$0xff]  ;;  %v430_v1 = vld [vmem:[#allocation2 + $0x30] sm:$0xff] }
   0xe   :  { %142 = vmatpush.bf16.msra.mxu0 %v431_v0  ;;  %v439_v2 = vld [vmem:[#allocation4 + $0x38] sm:$0xff]  ;;  %v438_v3 = vld [vmem:[#allocation4 + $0x30] sm:$0xff]  ;;  %v429_v4 = vld [vmem:[#allocation2 + $0x28] sm:$0xff] }
   0xf   :  { %225 = vmatpush.bf16.msra.mxu1 %v439_v2  ;;  %v437_v5 = vld [vmem:[#allocation4 + $0x28] sm:$0xff]  ;;  %v428_v6 = vld [vmem:[#allocation2 + $0x20] sm:$0xff]  ;;  %v427_v8 = vld [vmem:[#allocation2 + $0x18] sm:$0xff] }
  0x10   :  { %v436_v7 = vld [vmem:[#allocation4 + $0x20] sm:$0xff]  ;;  %v435_v9 = vld [vmem:[#allocation4 + $0x18] sm:$0xff]  ;;  %v426_v10 = vld [vmem:[#allocation2 + $0x10] sm:$0xff] }
  0x11   :  { %v434_v11 = vld [vmem:[#allocation4 + $0x10] sm:$0xff]  ;;  %v425_v12 = vld [vmem:[#allocation2 + $0x8] sm:$0xff]  ;;  %v424_v13 = vld [vmem:[#allocation2] sm:$0xff] }
  0x12   :  { %143 = vmatpush.bf16.msra.mxu0 %v430_v1  ;;  %v73_v14 = vld [vmem:[%s601_s0] sm:$0xf]  ;;  %v433_v15 = vld [vmem:[#allocation4 + $0x8] sm:$0xff]  ;;  %v447_v17 = vld [vmem:[#allocation6 + $0x38] sm:$0xff] }
  0x13   :  { %226 = vmatpush.bf16.msra.mxu1 %v438_v3  ;;  %v432_v16 = vld [vmem:[#allocation4] sm:$0xff]  ;;  %308 = vmatpush.bf16.msra.mxu2 %v447_v17  ;;  %v446_v18 = vld [vmem:[#allocation6 + $0x30] sm:$0xff]  ;;  %v445_v19 = vld [vmem:[#allocation6 + $0x28] sm:$0xff] }
  0x14   :  { %v444_v20 = vld [vmem:[#allocation6 + $0x20] sm:$0xff]  ;;  %v443_v21 = vld [vmem:[#allocation6 + $0x18] sm:$0xff]  ;;  %v442_v22 = vld [vmem:[#allocation6 + $0x10] sm:$0xff] }
  0x15   :  { %v453_v23 = vld [vmem:[%s603_s2] ss:$0 sm:$0xff]  ;;  %v441_v29 = vld [vmem:[#allocation6 + $0x8] sm:$0xff] }
  0x16   :  { %144 = vmatpush.bf16.msra.mxu0 %v429_v4  ;;  %v440_v30 = vld [vmem:[#allocation6] sm:$0xff] }
  0x17   :  { %227 = vmatpush.bf16.msra.mxu1 %v437_v5  ;;  %309 = vmatpush.bf16.msra.mxu2 %v446_v18  ;;  %v454_v31 = vld [vmem:[%s605_s4] ss:$0 sm:$0xff] }
  0x18   :  { %v455_v37 = vld [vmem:[%s607_s6] ss:$0 sm:$0xff] }
  0x1a   :  { %145 = vmatpush.bf16.msra.mxu0 %v428_v6 }
  0x1b   :  { %228 = vmatpush.bf16.msra.mxu1 %v436_v7  ;;  %310 = vmatpush.bf16.msra.mxu2 %v445_v19 }
  0x1e   :  { %146 = vmatpush.bf16.msra.mxu0 %v427_v8 }
  0x1f   :  { %229 = vmatpush.bf16.msra.mxu1 %v435_v9  ;;  %311 = vmatpush.bf16.msra.mxu2 %v444_v20 }
  0x22   :  { %147 = vmatpush.bf16.msra.mxu0 %v426_v10 }
  0x23   :  { %230 = vmatpush.bf16.msra.mxu1 %v434_v11  ;;  %312 = vmatpush.bf16.msra.mxu2 %v443_v21 }
  0x26   :  { %148 = vmatpush.bf16.msra.mxu0 %v425_v12 }
  0x27   :  { %231 = vmatpush.bf16.msra.mxu1 %v433_v15  ;;  %313 = vmatpush.bf16.msra.mxu2 %v442_v22 }
  0x2a   :  { %149 = vmatpush.bf16.msra.mxu0 %v424_v13 }
  0x2b   :  { %232 = vmatpush.bf16.msra.mxu1 %v432_v16  ;;  %314 = vmatpush.bf16.msra.mxu2 %v441_v29 }
  0x2d   :  { %150 = vmatmul.bf16.vlgmr.msra.gmra.mxu0 %v73_v14 }
  0x2f   :  { %315 = vmatpush.bf16.msra.mxu2 %v440_v30 }
  0xaa   :  { %v151_v24 = vpop.f32.mrf.mxu0 }
  0xab   :  { %v152_v25 = vadd.f32 %v453_v23, %v151_v24 }
  0xad   :  { %v155_v26 = vmax.f32 %v152_v25, 0.0 }
  0xaf   :  { %v156_v27 = vpack.c.bf16 %v155_v26, %v155_v26 }
  0xb1   :  { %233 = vmatmul.bf16.vlgmr.msra.gmra.mxu1 %v156_v27 }
  0xb2   :  { %v153_v28 = vpop.f32.mrf.mxu0 }
 0x12e   :  { %v234_v32 = vpop.f32.mrf.mxu1 }
 0x12f   :  { %v235_v33 = vadd.f32 %v454_v31, %v234_v32 }
 0x131   :  { %v238_v34 = vmax.f32 %v235_v33, 0.0 }
 0x133   :  { %v239_v35 = vpack.c.bf16 %v238_v34, %v238_v34 }
 0x135   :  { %316 = vmatmul.bf16.vlgmr.msra.gmra.mxu2 %v239_v35 }
 0x136   :  { %v236_v36 = vpop.f32.mrf.mxu1 }
 0x1b8   :  { %v317_v38 = vpop.f32.mrf.mxu2 }
 0x1b9   :  { %v318_v39 = vadd.f32 %v455_v37, %v317_v38 }
 0x1bb   :  { %321 = vst [vmem:[%s608_s7] sm:$0xff] %v318_v39 }
 0x1c0   :  { %v319_v40 = vpop.f32.mrf.mxu2 }
 0x1c1   :  { %326 = vsyncpa [#allocation3], 1 }
 0x1c2   :  { %327 = vsyncpa [#allocation5], 1 }

</bundles_post_ra>
